<compile_context>
chip_gen: v5e
topology: v5e:2x2
jax: 0.10.0
libtpu: 0.0.40
codegen_flags: <defaults>
</compile_context>

<pallas_src>
import jax
import jax.numpy as jnp
from jax.experimental import pallas as pl
from jax.experimental.pallas import tpu as pltpu

_LANE = 128


def _make_vpu_kernel(C_in, C_out):
    """Unrolled VPU multiply-accumulate for tiny channel counts.

    Refs:
      w_ref : SMEM (C_out, C_in) f32   -- scalar weights
      b_ref : SMEM (C_out,)      f32   -- scalar bias
      x_ref : VMEM (1, C_in, T)        -- lane axis = flattened H*W
      o_ref : VMEM (1, C_out, T)
    """

    def kernel(w_ref, b_ref, x_ref, o_ref):
        x = x_ref[0].astype(jnp.float32)                  # (C_in, T)
        rows = []
        for co in range(C_out):                           # fully unrolled (static)
            acc = x[0:1, :] * w_ref[co, 0]
            for ci in range(1, C_in):
                acc = acc + x[ci:ci + 1, :] * w_ref[co, ci]
            rows.append(acc + b_ref[co])                  # bias = per-row scalar add
        out = rows[0] if C_out == 1 else jnp.concatenate(rows, axis=0)
        o_ref[0] = out.astype(o_ref.dtype)                # single lane-dense store

    return kernel


def _mxu_kernel(w_ref, b_ref, x_ref, o_ref):
    """General path for larger channel counts: (C_out,C_in) @ (C_in,T) on the MXU."""
    acc = jnp.dot(w_ref[...], x_ref[0], preferred_element_type=jnp.float32)
    o_ref[0] = (acc + b_ref[...]).astype(o_ref.dtype)


def outconv_forward(x_nchw, weight, bias, *, tile_hw=None, vpu_threshold=256):
    """nn.Conv2d(in_channels, out_channels, kernel_size=1) forward.

    x_nchw : (N, C_in, H, W)
    weight : (C_out, C_in, 1, 1)   (PyTorch layout)
    bias   : (C_out,)
    returns (N, C_out, H, W)
    """
    N, C_in, H, W = x_nchw.shape
    C_out = weight.shape[0]
    HW = H * W

    # Free reshape (no transpose, no extra HBM traffic); output is already NCHW.
    x3 = x_nchw.reshape(N, C_in, HW)
    w2 = weight.reshape(C_out, C_in).astype(jnp.float32)
    b1 = bias.astype(jnp.float32)

    # Big lane tile (multiple of 128), bounded by a VMEM budget that leaves
    # headroom on v7x (64 MiB physical / 32 MiB scoped default).
    if tile_hw is None:
        vmem_budget = 16 * 1024 * 1024                  # bytes for double-buffered in+out
        bytes_per_lane = 2 * 4 * (C_in + C_out)         # 2 bufs, f32, in + out blocks
        cap = max(_LANE, (vmem_budget // bytes_per_lane) // _LANE * _LANE)
        hw128 = pl.cdiv(HW, _LANE) * _LANE
        tile_hw = min(hw128, cap)
    assert tile_hw % _LANE == 0

    # Pad the flattened spatial axis so tile_hw divides it (sliced off below);
    # removes any divisibility constraint on N*H*W.
    hw_pad = pl.cdiv(HW, tile_hw) * tile_hw
    if hw_pad != HW:
        x3 = jnp.pad(x3, ((0, 0), (0, 0), (0, hw_pad - HW)))

    grid = (N, hw_pad // tile_hw)                       # both axes fully parallel
    x_spec = pl.BlockSpec((1, C_in, tile_hw), lambda n, t: (n, 0, t))
    o_spec = pl.BlockSpec((1, C_out, tile_hw), lambda n, t: (n, 0, t))

    use_vpu = (C_in * C_out) <= vpu_threshold
    if use_vpu:
        # Tiny channels: skip the MXU; weights/bias are SMEM scalars.
        kernel = _make_vpu_kernel(C_in, C_out)
        w_spec = pl.BlockSpec(memory_space=pltpu.MemorySpace.SMEM)
        b_spec = pl.BlockSpec(memory_space=pltpu.MemorySpace.SMEM)
        b_arg = b1
    else:
        kernel = _mxu_kernel
        w_spec = pl.BlockSpec((C_out, C_in), lambda n, t: (0, 0))
        b_spec = pl.BlockSpec((C_out, 1), lambda n, t: (0, 0))
        b_arg = b1.reshape(C_out, 1)

    out3 = pl.pallas_call(
        kernel,
        out_shape=jax.ShapeDtypeStruct((N, C_out, hw_pad), x_nchw.dtype),
        grid_spec=pltpu.PrefetchScalarGridSpec(
            num_scalar_prefetch=0,
            grid=grid,
            in_specs=[w_spec, b_spec, x_spec],
            out_specs=o_spec,
        ),
        compiler_params=pltpu.CompilerParams(
            dimension_semantics=("parallel", "parallel"),
        ),
    )(w2, b_arg, x3)

    if hw_pad != HW:
        out3 = out3[:, :, :HW]
    return out3.reshape(N, C_out, H, W)


if __name__ == "__main__":
    key = jax.random.PRNGKey(0)
    k_x, k_w, k_b = jax.random.split(key, 3)

    N, C_in, C_out, H, W = 2, 4, 3, 16, 16

    x = jax.random.normal(k_x, (N, C_in, H, W), dtype=jnp.float32)
    # Deterministic synthetic parameters (shapes match nn.Conv2d(C_in, C_out, 1)).
    weight = jax.random.normal(k_w, (C_out, C_in, 1, 1), dtype=jnp.float32) * 0.1
    bias = jax.random.normal(k_b, (C_out,), dtype=jnp.float32) * 0.1

    out = outconv_forward(x, weight, bias)
    out = jax.block_until_ready(out)

    # Reference check in plain JAX (same math as PyTorch 1x1 conv).
    ref = jnp.einsum("nchw,oc->nohw", x, weight.reshape(C_out, C_in)) + bias[None, :, None, None]
    assert out.shape == (N, C_out, H, W)
    assert jnp.allclose(out, ref, atol=1e-5, rtol=1e-5)

    print("KERNEL_OK")
</pallas_src>

<mosaic_0001>
module attributes {stable_mosaic.version = 11 : i64} {
  func.func @kernel(%arg0: i32, %arg1: i32, %arg2: memref<3x4xf32, #tpu.memory_space<smem>>, %arg3: memref<3xf32, #tpu.memory_space<smem>>, %arg4: memref<1x4x256xf32, #tpu.memory_space<vmem>>, %arg5: memref<1x3x256xf32, #tpu.memory_space<vmem>>) attributes {dimension_semantics = [#tpu.dimension_semantics<parallel>, #tpu.dimension_semantics<parallel>], iteration_bounds = array<i64: 2, 1>, scalar_prefetch = 0 : i64, scratch_operands = 0 : i64, tpu.core_type = #tpu.core_type<tc>, window_params = [{transform_indices = @transform_0, window_bounds = array<i64: 3, 4>}, {transform_indices = @transform_1, window_bounds = array<i64: 3>}, {transform_indices = @transform_2, window_bounds = array<i64: 1, 4, 256>}, {transform_indices = @transform_3, window_bounds = array<i64: 1, 3, 256>}]} {
    %c0 = arith.constant 0 : index
    %c0_0 = arith.constant 0 : index
    %c0_1 = arith.constant 0 : index
    %0 = vector.load %arg4[%c0, %c0_0, %c0_1] : memref<1x4x256xf32, #tpu.memory_space<vmem>>, vector<1x4x256xf32>
    %1 = vector.shape_cast %0 : vector<1x4x256xf32> to vector<4x256xf32>
    %2 = vector.extract_strided_slice %1 {offsets = [0, 0], sizes = [1, 256], strides = [1, 1]} : vector<4x256xf32> to vector<1x256xf32>
    %c0_2 = arith.constant 0 : index
    %c0_3 = arith.constant 0 : index
    %3 = memref.load %arg2[%c0_2, %c0_3] : memref<3x4xf32, #tpu.memory_space<smem>>
    %4 = vector.broadcast %3 : f32 to vector<1x256xf32>
    %5 = arith.mulf %2, %4 : vector<1x256xf32>
    %6 = vector.extract_strided_slice %1 {offsets = [1, 0], sizes = [1, 256], strides = [1, 1]} : vector<4x256xf32> to vector<1x256xf32>
    %c0_4 = arith.constant 0 : index
    %c1 = arith.constant 1 : index
    %7 = memref.load %arg2[%c0_4, %c1] : memref<3x4xf32, #tpu.memory_space<smem>>
    %8 = vector.broadcast %7 : f32 to vector<1x256xf32>
    %9 = arith.mulf %6, %8 : vector<1x256xf32>
    %10 = arith.addf %5, %9 : vector<1x256xf32>
    %11 = vector.extract_strided_slice %1 {offsets = [2, 0], sizes = [1, 256], strides = [1, 1]} : vector<4x256xf32> to vector<1x256xf32>
    %c0_5 = arith.constant 0 : index
    %c2 = arith.constant 2 : index
    %12 = memref.load %arg2[%c0_5, %c2] : memref<3x4xf32, #tpu.memory_space<smem>>
    %13 = vector.broadcast %12 : f32 to vector<1x256xf32>
    %14 = arith.mulf %11, %13 : vector<1x256xf32>
    %15 = arith.addf %10, %14 : vector<1x256xf32>
    %16 = vector.extract_strided_slice %1 {offsets = [3, 0], sizes = [1, 256], strides = [1, 1]} : vector<4x256xf32> to vector<1x256xf32>
    %c0_6 = arith.constant 0 : index
    %c3 = arith.constant 3 : index
    %17 = memref.load %arg2[%c0_6, %c3] : memref<3x4xf32, #tpu.memory_space<smem>>
    %18 = vector.broadcast %17 : f32 to vector<1x256xf32>
    %19 = arith.mulf %16, %18 : vector<1x256xf32>
    %20 = arith.addf %15, %19 : vector<1x256xf32>
    %c0_7 = arith.constant 0 : index
    %21 = memref.load %arg3[%c0_7] : memref<3xf32, #tpu.memory_space<smem>>
    %22 = vector.broadcast %21 : f32 to vector<1x256xf32>
    %23 = arith.addf %20, %22 : vector<1x256xf32>
    %24 = vector.extract_strided_slice %1 {offsets = [0, 0], sizes = [1, 256], strides = [1, 1]} : vector<4x256xf32> to vector<1x256xf32>
    %c1_8 = arith.constant 1 : index
    %c0_9 = arith.constant 0 : index
    %25 = memref.load %arg2[%c1_8, %c0_9] : memref<3x4xf32, #tpu.memory_space<smem>>
    %26 = vector.broadcast %25 : f32 to vector<1x256xf32>
    %27 = arith.mulf %24, %26 : vector<1x256xf32>
    %28 = vector.extract_strided_slice %1 {offsets = [1, 0], sizes = [1, 256], strides = [1, 1]} : vector<4x256xf32> to vector<1x256xf32>
    %c1_10 = arith.constant 1 : index
    %c1_11 = arith.constant 1 : index
    %29 = memref.load %arg2[%c1_10, %c1_11] : memref<3x4xf32, #tpu.memory_space<smem>>
    %30 = vector.broadcast %29 : f32 to vector<1x256xf32>
    %31 = arith.mulf %28, %30 : vector<1x256xf32>
    %32 = arith.addf %27, %31 : vector<1x256xf32>
    %33 = vector.extract_strided_slice %1 {offsets = [2, 0], sizes = [1, 256], strides = [1, 1]} : vector<4x256xf32> to vector<1x256xf32>
    %c1_12 = arith.constant 1 : index
    %c2_13 = arith.constant 2 : index
    %34 = memref.load %arg2[%c1_12, %c2_13] : memref<3x4xf32, #tpu.memory_space<smem>>
    %35 = vector.broadcast %34 : f32 to vector<1x256xf32>
    %36 = arith.mulf %33, %35 : vector<1x256xf32>
    %37 = arith.addf %32, %36 : vector<1x256xf32>
    %38 = vector.extract_strided_slice %1 {offsets = [3, 0], sizes = [1, 256], strides = [1, 1]} : vector<4x256xf32> to vector<1x256xf32>
    %c1_14 = arith.constant 1 : index
    %c3_15 = arith.constant 3 : index
    %39 = memref.load %arg2[%c1_14, %c3_15] : memref<3x4xf32, #tpu.memory_space<smem>>
    %40 = vector.broadcast %39 : f32 to vector<1x256xf32>
    %41 = arith.mulf %38, %40 : vector<1x256xf32>
    %42 = arith.addf %37, %41 : vector<1x256xf32>
    %c1_16 = arith.constant 1 : index
    %43 = memref.load %arg3[%c1_16] : memref<3xf32, #tpu.memory_space<smem>>
    %44 = vector.broadcast %43 : f32 to vector<1x256xf32>
    %45 = arith.addf %42, %44 : vector<1x256xf32>
    %46 = vector.extract_strided_slice %1 {offsets = [0, 0], sizes = [1, 256], strides = [1, 1]} : vector<4x256xf32> to vector<1x256xf32>
    %c2_17 = arith.constant 2 : index
    %c0_18 = arith.constant 0 : index
    %47 = memref.load %arg2[%c2_17, %c0_18] : memref<3x4xf32, #tpu.memory_space<smem>>
    %48 = vector.broadcast %47 : f32 to vector<1x256xf32>
    %49 = arith.mulf %46, %48 : vector<1x256xf32>
    %50 = vector.extract_strided_slice %1 {offsets = [1, 0], sizes = [1, 256], strides = [1, 1]} : vector<4x256xf32> to vector<1x256xf32>
    %c2_19 = arith.constant 2 : index
    %c1_20 = arith.constant 1 : index
    %51 = memref.load %arg2[%c2_19, %c1_20] : memref<3x4xf32, #tpu.memory_space<smem>>
    %52 = vector.broadcast %51 : f32 to vector<1x256xf32>
    %53 = arith.mulf %50, %52 : vector<1x256xf32>
    %54 = arith.addf %49, %53 : vector<1x256xf32>
    %55 = vector.extract_strided_slice %1 {offsets = [2, 0], sizes = [1, 256], strides = [1, 1]} : vector<4x256xf32> to vector<1x256xf32>
    %c2_21 = arith.constant 2 : index
    %c2_22 = arith.constant 2 : index
    %56 = memref.load %arg2[%c2_21, %c2_22] : memref<3x4xf32, #tpu.memory_space<smem>>
    %57 = vector.broadcast %56 : f32 to vector<1x256xf32>
    %58 = arith.mulf %55, %57 : vector<1x256xf32>
    %59 = arith.addf %54, %58 : vector<1x256xf32>
    %60 = vector.extract_strided_slice %1 {offsets = [3, 0], sizes = [1, 256], strides = [1, 1]} : vector<4x256xf32> to vector<1x256xf32>
    %c2_23 = arith.constant 2 : index
    %c3_24 = arith.constant 3 : index
    %61 = memref.load %arg2[%c2_23, %c3_24] : memref<3x4xf32, #tpu.memory_space<smem>>
    %62 = vector.broadcast %61 : f32 to vector<1x256xf32>
    %63 = arith.mulf %60, %62 : vector<1x256xf32>
    %64 = arith.addf %59, %63 : vector<1x256xf32>
    %c2_25 = arith.constant 2 : index
    %65 = memref.load %arg3[%c2_25] : memref<3xf32, #tpu.memory_space<smem>>
    %66 = vector.broadcast %65 : f32 to vector<1x256xf32>
    %67 = arith.addf %64, %66 : vector<1x256xf32>
    %68 = tpu.concatenate %23, %45, %67 in 0 : vector<1x256xf32>, vector<1x256xf32>, vector<1x256xf32> -> vector<3x256xf32>
    %c0_26 = arith.constant 0 : index
    %c0_27 = arith.constant 0 : index
    %c0_28 = arith.constant 0 : index
    %69 = vector.load %arg5[%c0_26, %c0_27, %c0_28] : memref<1x3x256xf32, #tpu.memory_space<vmem>>, vector<1x3x256xf32>
    %70 = vector.shape_cast %69 : vector<1x3x256xf32> to vector<3x256xf32>
    %71 = vector.shape_cast %68 : vector<3x256xf32> to vector<1x3x256xf32>
    tpu.vector_store %arg5[%c0_26, %c0_27, %c0_28], %71 {strides = array<i32>} : memref<1x3x256xf32, #tpu.memory_space<vmem>>, vector<1x3x256xf32>,
    return
  }
  func.func @transform_0(%arg0: i32, %arg1: i32) -> (i32, i32) {
    %c0_i32 = arith.constant 0 : i32
    %c0_i32_0 = arith.constant 0 : i32
    %c0_i32_1 = arith.constant 0 : i32
    return %c0_i32, %c0_i32_0 : i32, i32
  }
  func.func @transform_1(%arg0: i32, %arg1: i32) -> i32 {
    %c0_i32 = arith.constant 0 : i32
    %c0_i32_0 = arith.constant 0 : i32
    return %c0_i32 : i32
  }
  func.func @transform_2(%arg0: i32, %arg1: i32) -> (i32, i32, i32) {
    %c0_i32 = arith.constant 0 : i32
    %c0_i32_0 = arith.constant 0 : i32
    return %arg0, %c0_i32, %arg1 : i32, i32, i32
  }
  func.func @transform_3(%arg0: i32, %arg1: i32) -> (i32, i32, i32) {
    %c0_i32 = arith.constant 0 : i32
    %c0_i32_0 = arith.constant 0 : i32
    return %arg0, %c0_i32, %arg1 : i32, i32, i32
  }
}

</mosaic_0001>

<bundles_post_ra>
// kernel: tpu_custom_call.1
= control target key start
LH: loop header
LB: loop body
LE: loop exit
PB: predicated region body
PF: predicated region fallthrough
CT: control target
= control target key end

     0   :  { %8 = vsyncpa [#allocation4], 0  ;;  %s867_s0 = inlined_call_operand.hbm [shape: f32[3,4], index: 0, kind: input, shape index: {}]   ;;  %s868_s1 = inlined_call_operand.hbm [shape: f32[3], index: 1, kind: input, shape index: {}]   ;;  %s869_s2 = inlined_call_operand.hbm [shape: f32[2,4,256], index: 2, kind: input, shape index: {}]   ;;  %s870_s3 = inlined_call_operand.vmem [shape: f32[2,3,256], index: 3, kind: output, shape index: {}]  }
   0x1   :  { %9 = vsyncpa [#allocation6], 0 }
   0x2   :  { %10 = vsyncpa [#allocation3], 0 }
   0x3   :  { %12 = vsyncpa [#allocation3 + $0x1], 0  ;;  %s741_s12 = smov 0   ;;  %s743_s13 = smov 0  }
   0x4   :  { %s745_s14 = smov 0   ;;  %s747_s15 = smov 0  }
   0x5   :  { %s749_s16 = smov 0   ;;  %s751_s17 = smov 0  }
   0x6 LB: > { %s482_s18 = sadd.s32 4294967295, %s717_s17   ;;  %p94_p0 = scmp.ne.s32.totalorder %s701_s13, %s697_s12  ;;  %s717_s17 = sphi %s751_s17, %s18_s17   ;;  %s713_s16 = sphi %s749_s16, %s879_s16   ;;  %s709_s15 = sphi %s747_s15, %s878_s15   ;;  %s705_s14 = sphi %s745_s14, %s877_s14   ;;  %s701_s13 = sphi %s743_s13, %s876_s13   ;;  %s697_s12 = sphi %s741_s12, %s875_s12  }
   0x7   : > { %p771_p1 = scmp.eq.s32.totalorder %s482_s18, 0  ;;  %p484_p2 = scmp.ge.s32.totalorder %s717_s17, 1 }
   0x8   : > { %p133_p3 = scmp.lt.s32.totalorder %s717_s17, 3  ;;  %s145_s23 = sshll.u32 %s867_s0, 4  ;;  %s146_s23 = int_to_ptr.hbm [resolvable:$true] %s145_s23 }
   0x9   : > { %p779_p4 = por %p771_p1, %p94_p0  ;;  %s155_s27 = sshll.u32 %s868_s1, 4  ;;  %s156_s27 = int_to_ptr.hbm [resolvable:$true] %s155_s27 }
   0xa   : > { %p786_p5 = pnand %p484_p2, %p133_p3  ;;  %s719_s28 = smov [#allocation2]  }
   0xb   : > { %s720_s29 = smov [#allocation5]   ;;  %s30_s30 = sadd.s32 1, %s713_s16 }
   0xc   : > { %p533_p6 = pneg %p786_p5  ;;  %s81_s4 = sadd.s32 1, %s705_s14 }
   0xd   : > { %p32_p8 = scmp.ge.s32.totalorder %s30_s30, 2  ;;  %p88_p9 = scmp.ne.s32.totalorder %s705_s14, %s701_s13 }
   0xe   : > { %p534_p7 = pnand %p533_p6, %p771_p1  ;;  %p89_p10 = scmp.eq.s32.totalorder %s717_s17, 0 }
   0xf   : > { %p546_p11 = scmp.lt.s32.totalorder %s717_s17, 2  ;;  %s881_s30 = smov (%p32_p8, %s30_s30), 0 }
  0x10   : > { %536 = dma.hbm_to_smem (!%p534_p7), %s146_s23, 64, %s719_s28, [#allocation4]  }
  0x11   : > { %539 = dma.hbm_to_smem (!%p534_p7), %s156_s27, 16, %s720_s29, [#allocation6]  }
  0x12   : > { %p805_p12 = por %p89_p10, %p88_p9  ;;  %s166_s6 = sand.u32 1, %s705_s14  }
  0x13   : > { %s76_s7 = ssub.s32 %s713_s16, %s881_s30  ;;  %s488_s8 = sshll.u32 %s166_s6, 3 }
  0x14   : > { %p79_p13 = scmp.eq.s32.totalorder %s76_s7, 0  ;;  %s521_s9 = sshll.u32 %s713_s16, 3 }
  0x15   : > { %s177_s18 = scalar_lea.hbm %s869_s2, %s521_s9  ;;  %s170_s21 = scalar_lea.vmem [#allocation7], %s488_s8 }
  0x16   : > { %s814_s10 = scalar_select %p79_p13, %s705_s14, %s81_s4  }
  0x17   : > { %s181_s22 = sshll.u32 %s170_s21, 4  ;;  %s179_s23 = sshll.u32 %s177_s18, 4  ;;  %s182_s22 = int_to_ptr.vmem [resolvable:$true] %s181_s22  ;;  %s180_s23 = int_to_ptr.hbm [resolvable:$true] %s179_s23 }
  0x18   : > { %p541_p0 = pnand %p546_p11, %p805_p12  ;;  %s167_s25 = scalar_lea.sflag [#allocation3], %s166_s6 }
  0x19   : > { %190 = sbr.rel (%p786_p5) target bundleno = 76 (0x4c), region = 32 }
  0x1a   : > { %543 = dma.hbm_to_vmem [thread:$0]  (!%p541_p0), %s180_s23, 128, %s182_s22, %s167_s25  }
  0x1e   : > { %684 = dma.done.wait (%p771_p1), [#allocation4], 64  }
  0x1f   : > { %686 = vsyncadd (%p771_p1), [#allocation4], 4294967232 }
  0x20   : > { %688 = dma.done.wait (%p771_p1), [#allocation6], 16  }
  0x21   : > { %690 = vsyncadd (%p771_p1), [#allocation6], 4294967280  ;;  %s202_s26 = sand.u32 1, %s701_s13  }
  0x22   : > { %s494_s27 = sshll.u32 %s202_s26, 3  ;;  %s203_s28 = scalar_lea.sflag [#allocation3], %s202_s26 }
  0x23   : > { %s206_s29 = scalar_lea.vmem [#allocation7], %s494_s27 }
  0x24   : > { %692 = dma.done.wait (%p779_p4), %s203_s28, 128  }
  0x25   : > { %694 = vsyncadd (%p779_p4), %s203_s28, 4294967168 }
  0x26   : > { %212 = sfence }
  0x27   : > { %s247_s24 = sld [smem:[#allocation2]]  ;;  %v246_v0 = vld [vmem:[%s206_s29] sm:$0xff]  ;;  %p237_p1 = scmp.lt.s32.totalorder %s709_s15, 1  ;;  %vm352_vm0 = vcmask 1040384   ;;  %vm355_vm1 = vcmask 1041408   ;;  %vm361_vm2 = vcmask 1043456  }
  0x28   : > { %s497_s4 = sld [smem:[#allocation2 + $0x1]] }
  0x29   : > { %s499_s5 = sld [smem:[#allocation2 + $0x2]]  ;;  %s883_s15 = smov (!%p237_p1, %s709_s15), 1 }
  0x2a   : > { %s501_s6 = sld [smem:[#allocation2 + $0x3]]  ;;  %s522_s25 = sshll.u32 %s883_s15, 3 }
  0x2b   : > { %s838_s7 = sld [smem:[#allocation5]]  ;;  %s244_s28 = scalar_lea.vmem %s870_s3, %s522_s25 }
  0x2c   : > { %s503_s19 = sld [smem:[#allocation2 + $0x80]] }
  0x2d   : > { %v248_v1 = vstv %s247_s24  ;;  %s504_s8 = sld [smem:[#allocation2 + $0x81]] }
  0x2e   : > { %v251_v2 = vstv %s497_s4  ;;  %v249_v3 = vmul.f32 %v248_v1, %v246_v0  ;;  %s506_s9 = sld [smem:[#allocation2 + $0x82]] }
  0x2f   : > { %v252_v4 = vmul.f32 %v251_v2, %v246_v0  ;;  %v259_v5 = vstv %s499_s5  ;;  %s508_s11 = sld [smem:[#allocation2 + $0x83]] }
  0x30   : > { %v260_v7 = vmul.f32 %v259_v5, %v246_v0  ;;  %v267_v8 = vstv %s501_s6  ;;  %s840_s20 = sld [smem:[#allocation5 + $0x1]] }
  0x31   : > { %v498_v6 = vrot.slane %v252_v4, 9  ;;  %v268_v9 = vmul.f32 %v267_v8, %v246_v0  ;;  %s511_s12 = sld [smem:[#allocation2 + $0x100]]  ;;  %v275_v25 = vstv %s838_s7 }
  0x32   : > { %v500_v11 = vrot.slane %v260_v7, 10  ;;  %v278_v12 = vstv %s503_s19  ;;  %s512_s18 = sld [smem:[#allocation2 + $0x101]] }
  0x33   : > { %v257_v10 = vadd.f32 %v498_v6, %v249_v3  ;;  %v281_v13 = vstv %s504_s8  ;;  %s514_s21 = sld [smem:[#allocation2 + $0x102]]  ;;  %v279_v14 = vmul.f32 %v278_v12, %v246_v0  ;;  %v502_v18 = vrot.slane %v268_v9, 11 }
  0x34   : > { %v282_v15 = vmul.f32 %v281_v13, %v246_v0  ;;  %v289_v16 = vstv %s506_s9  ;;  %s516_s22 = sld [smem:[#allocation2 + $0x103]] }
  0x35   : > { %v265_v17 = vadd.f32 %v500_v11, %v257_v10  ;;  %v290_v19 = vmul.f32 %v289_v16, %v246_v0  ;;  %v297_v20 = vstv %s508_s11  ;;  %s518_s23 = sld [smem:[#allocation5 + $0x2]] }
  0x36   : > { %v505_v21 = vrot.slane %v282_v15, 9  ;;  %v298_v22 = vmul.f32 %v297_v20, %v246_v0  ;;  %v305_v36 = vstv %s840_s20 }
  0x37   : > { %v507_v23 = vrot.slane %v290_v19, 10  ;;  %v308_v24 = vstv %s511_s12  ;;  %v273_v28 = vadd.f32 %v502_v18, %v265_v17 }
  0x38   : > { %v287_v26 = vadd.f32 %v505_v21, %v279_v14  ;;  %v509_v27 = vrot.slane %v298_v22, 11  ;;  %v309_v29 = vmul.f32 %v308_v24, %v246_v0  ;;  %v311_v30 = vstv %s512_s18 }
  0x39   : > { %v319_v31 = vstv %s514_s21  ;;  %v312_v33 = vmul.f32 %v311_v30, %v246_v0  ;;  %v276_v41 = vadd.f32 %v275_v25, %v273_v28 }
  0x3a   : > { %v295_v32 = vadd.f32 %v507_v23, %v287_v26  ;;  %v320_v34 = vmul.f32 %v319_v31, %v246_v0  ;;  %v327_v35 = vstv %s516_s22 }
  0x3b   : > { %v328_v37 = vmul.f32 %v327_v35, %v246_v0  ;;  %v513_v39 = vrot.slane %v312_v33, 9  ;;  %v335_v46 = vstv %s518_s23  ;;  %v338_v47 = vperm.slane %v276_v41, 0 }
  0x3c   : > { %v303_v38 = vadd.f32 %v509_v27, %v295_v32  ;;  %v515_v40 = vrot.slane %v320_v34, 10  ;;  %v339_v48 = vperm.slane %v276_v41, 4 }
  0x3d   : > { %v317_v43 = vadd.f32 %v513_v39, %v309_v29  ;;  %v517_v44 = vrot.slane %v328_v37, 11 }
  0x3e   : > { %v306_v42 = vadd.f32 %v305_v36, %v303_v38 }
  0x3f   : > { %v325_v45 = vadd.f32 %v515_v40, %v317_v43 }
  0x40   : > { %v343_v49 = vperm.slane %v306_v42, 0  ;;  %v344_v50 = vperm.slane %v306_v42, 4 }
  0x41   : > { %v333_v51 = vadd.f32 %v517_v44, %v325_v45 }
  0x42   : > { %v353_v53 = vsel %vm352_vm0, %v338_v47, %v343_v49  ;;  %v354_v54 = vsel %vm352_vm0, %v339_v48, %v344_v50 }
  0x43   : > { %v336_v52 = vadd.f32 %v335_v46, %v333_v51 }
  0x45   : > { %v348_v55 = vperm.slane %v336_v52, 0  ;;  %v349_v56 = vperm.slane %v336_v52, 4 }
  0x47   : > { %v356_v57 = vsel %vm355_vm1, %v353_v53, %v348_v55  ;;  %v357_v58 = vsel %vm355_vm1, %v354_v54, %v349_v56 }
  0x48   : > { %v360_v59 = vrot.slane %v357_v58, 4 }
  0x4a   : > { %v362_v60 = vsel %vm361_vm2, %v356_v57, %v360_v59 }
  0x4b   : > { %364 = vst [vmem:[%s244_s28] sm:$0x77] %v362_v60 }
  0x4c PF: > { %s18_s17 = sadd.s32 1, %s717_s17   ;;  %s875_s12 = smov %s701_s13 }
  0x4d   : > { %p15_p2 = scmp.ge.s32.totalorder %s18_s17, 4   ;;  %s876_s13 = smov %s705_s14 }
  0x4e   : > { %s877_s14 = smov %s814_s10  ;;  %s878_s15 = smov %s713_s16 }
  0x4f   : > { %s879_s16 = smov %s881_s30  ;;  %17 = sbr.rel (!%p15_p2) target bundleno = 6 (0x6), region = 81 }
  0x54   :  { %395 = vsyncpa [#allocation3], 1 }
  0x55   :  { %397 = vsyncpa [#allocation3 + $0x1], 1 }
  0x56   :  { %398 = vsyncpa [#allocation4], 1 }
  0x57   :  { %400 = vsyncpa [#allocation4 + $0x1], 1 }
  0x58   :  { %401 = vsyncpa [#allocation6], 1 }

</bundles_post_ra>
